<compile_context>
chip_gen: v7x
topology: tpu7x:2x2x1
jax: 0.10.0
libtpu: 0.0.40
codegen_flags: <defaults>
</compile_context>

<pallas_src>
import jax
import jax.numpy as jnp
from jax.experimental import pallas as pl
from jax.experimental.pallas import tpu as pltpu


# Per input tile budget (the output tile is the same size).  Steady-state
# VMEM footprint with double buffering is ~4x this.
_TILE_BUDGET_BYTES = 4 * 1024 * 1024
# Hard cap for the (rare) case where only the full-H slab is a legal tile.
_MAX_RESIDENT_BYTES = 24 * 1024 * 1024
# Explicit scoped-VMEM limit: safe on v5e/v6e (128 MiB physical) and v7x (64).
_VMEM_LIMIT_BYTES = 32 * 1024 * 1024

_FAST_KERNEL_OK = True  # flipped off if the lane-dense kernel fails to lower


def _nhwc_fast_kernel(x_ref, o_ref):
    # x_ref: (C, tH*W) lane-dense load; o_ref: lane-dense regrouped store.
    y = jnp.transpose(x_ref[...], (1, 0))   # clean 2-D XLU transpose -> (tH*W, C)
    o_ref[...] = y.reshape(o_ref.shape)     # row-major regroup (same linear order)


def _nhwc_safe_kernel(x_ref, o_ref):
    # x_ref: (C, tH, W); o_ref: (tH, W, C).  Conservative layouts, proven ops.
    o_ref[...] = jnp.transpose(x_ref[...], (1, 2, 0))


def _legal_tile_h(th, h, w):
    # (8, 128) block-shape constraints for both kernel variants.
    return th == h or (th % 8 == 0 and (th * w) % 128 == 0)


def _choose_tile_h(h, w, c, itemsize):
    """Largest tH dividing H whose tile fits the budget and is layout-legal."""
    row_bytes = c * w * itemsize
    budget_rows = max(1, _TILE_BUDGET_BYTES // row_bytes)
    best = None
    for th in range(1, h + 1):
        if h % th == 0 and _legal_tile_h(th, h, w) and th <= budget_rows:
            best = th
    if best is None and 4 * c * h * w * itemsize <= _MAX_RESIDENT_BYTES:
        best = h  # no legal sub-tile: take the full-H slab if it still fits
    return best


def _common_call_kwargs(x, grid):
    return dict(
        grid=grid,
        compiler_params=pltpu.CompilerParams(
            dimension_semantics=("parallel", "parallel"),
            vmem_limit_bytes=_VMEM_LIMIT_BYTES,
        ),
        cost_estimate=pl.CostEstimate(
            flops=0,
            transcendentals=0,
            bytes_accessed=int(2 * x.size * x.dtype.itemsize),
        ),
    )


def _nhwc_fast_call(x, th):
    n, c, h, w = x.shape
    x2 = x.reshape(n, c, h * w)                          # metadata-only
    if th == h:
        # Single H-tile per batch: maximally lane-dense flattened output slab.
        out_view = (n, 1, h * w * c)
        out_block = (pl.Squeezed(), 1, h * w * c)
    else:
        # Legality check guarantees th % 8 == 0 here.  Pin the sublane dim to
        # the minimum legal 8 and push everything else into the lane dim.
        g = th // 8
        out_view = (n, h // g, g * w * c)
        out_block = (pl.Squeezed(), 8, g * w * c)
    y2 = pl.pallas_call(
        _nhwc_fast_kernel,
        out_shape=jax.ShapeDtypeStruct(out_view, x.dtype),
        in_specs=[pl.BlockSpec((pl.Squeezed(), c, th * w),
                               lambda b, hb: (b, 0, hb))],
        out_specs=pl.BlockSpec(out_block, lambda b, hb: (b, hb, 0)),
        **_common_call_kwargs(x, (n, h // th)),
    )(x2)
    return y2.reshape(n, h, w, c)                        # metadata-only


def _nhwc_safe_call(x, th):
    n, c, h, w = x.shape
    return pl.pallas_call(
        _nhwc_safe_kernel,
        out_shape=jax.ShapeDtypeStruct((n, h, w, c), x.dtype),
        in_specs=[pl.BlockSpec((pl.Squeezed(), c, th, w),
                               lambda b, hb: (b, 0, hb, 0))],
        out_specs=pl.BlockSpec((pl.Squeezed(), th, w, c),
                               lambda b, hb: (b, hb, 0, 0)),
        **_common_call_kwargs(x, (n, h // th)),
    )(x)


def _nchw_to_nhwc(x, tile_h=None):
    global _FAST_KERNEL_OK
    n, c, h, w = x.shape
    itemsize = jnp.dtype(x.dtype).itemsize
    if tile_h is None:
        th = _choose_tile_h(h, w, c, itemsize)
    else:
        th = int(tile_h)
        if h % th or not _legal_tile_h(th, h, w):
            raise ValueError(f"tile_h={th} is not a legal H tile for H={h}, W={w}")
    if th is None:
        # No legal tiling within the VMEM budget; XLA's copy-transpose is
        # already near the HBM roofline for a bare, unfused permutation.
        return jnp.transpose(x, (0, 2, 3, 1))
    if _FAST_KERNEL_OK:
        try:
            return _nhwc_fast_call(x, th)
        except Exception:
            # Mosaic rejected the in-kernel minor-dim regroup on this
            # toolchain; use the conservative-layout kernel instead.
            _FAST_KERNEL_OK = False
    return _nhwc_safe_call(x, th)


def permutation_layer(x, dims, tile_h=None):
    """Pallas equivalent of PermutationLayer(*dims).forward(x)."""
    dims = tuple(int(d) for d in dims)
    if len(dims) != x.ndim or sorted(dims) != list(range(x.ndim)):
        raise ValueError(f"dims {dims} is not a permutation of rank {x.ndim}")
    if x.ndim == 4 and dims == (0, 2, 3, 1):
        return _nchw_to_nhwc(x, tile_h=tile_h)
    # TODO(synk): other permutations (e.g. ones that move the batch axis) use
    # XLA's transpose; add dedicated Pallas tilings if they show up hot.
    return jnp.transpose(x, dims)


if __name__ == "__main__":
    key = jax.random.PRNGKey(0)
    # NCHW input, consistent with the PyTorch module's typical use.
    x = jax.random.normal(key, (2, 4, 16, 16), dtype=jnp.float32)
    dims = (0, 2, 3, 1)  # NCHW -> NHWC
    ref = jnp.transpose(x, dims)

    # Auto-tiled call (tH == H for this small shape: grid (N, 1), fully
    # flattened lane-dense output blocks of width H*W*C = 1024).
    y = jax.block_until_ready(permutation_layer(x, dims))
    assert y.shape == ref.shape and y.dtype == ref.dtype
    assert jnp.array_equal(y, ref), "permutation mismatch vs. jnp.transpose"

    # Also exercise the multi-tile grid path (tH = 8 -> grid (N, 2)).
    y_tiled = jax.block_until_ready(permutation_layer(x, dims, tile_h=8))
    assert jnp.array_equal(y_tiled, ref), "tiled permutation mismatch"

    # A non-NHWC permutation takes the XLA transpose path (same semantics).
    dims2 = (0, 3, 1, 2)
    y2 = jax.block_until_ready(permutation_layer(x, dims2))
    assert jnp.array_equal(y2, jnp.transpose(x, dims2)), "generic permute mismatch"

    print("KERNEL_OK")
</pallas_src>

<mosaic_0001>
module attributes {stable_mosaic.version = 11 : i64} {
  func.func @_nhwc_fast_kernel(%arg0: i32, %arg1: i32, %arg2: memref<1x4x256xf32, #tpu.memory_space<vmem>>, %arg3: memref<1x1x1024xf32, #tpu.memory_space<vmem>>) attributes {dimension_semantics = [#tpu.dimension_semantics<parallel>, #tpu.dimension_semantics<parallel>], iteration_bounds = array<i64: 2, 1>, scalar_prefetch = 0 : i64, scratch_operands = 0 : i64, tpu.core_type = #tpu.core_type<tc>, window_params = [{transform_indices = @transform_0, window_bounds = array<i64: 1, 4, 256>}, {transform_indices = @transform_1, window_bounds = array<i64: 1, 1, 1024>}]} {
    %c0 = arith.constant 0 : index
    %c0_0 = arith.constant 0 : index
    %c0_1 = arith.constant 0 : index
    %0 = vector.load %arg2[%c0, %c0_0, %c0_1] : memref<1x4x256xf32, #tpu.memory_space<vmem>>, vector<1x4x256xf32>
    %1 = vector.shape_cast %0 : vector<1x4x256xf32> to vector<4x256xf32>
    %2 = tpu.transpose %1, [1, 0] : vector<4x256xf32> -> vector<256x4xf32>
    %3 = vector.shape_cast %2 : vector<256x4xf32> to vector<1x1024xf32>
    %c0_2 = arith.constant 0 : index
    %c0_3 = arith.constant 0 : index
    %c0_4 = arith.constant 0 : index
    %4 = vector.load %arg3[%c0_2, %c0_3, %c0_4] : memref<1x1x1024xf32, #tpu.memory_space<vmem>>, vector<1x1x1024xf32>
    %5 = vector.shape_cast %4 : vector<1x1x1024xf32> to vector<1x1024xf32>
    %6 = vector.shape_cast %3 : vector<1x1024xf32> to vector<1x1x1024xf32>
    tpu.vector_store %arg3[%c0_2, %c0_3, %c0_4], %6 {strides = array<i32>} : memref<1x1x1024xf32, #tpu.memory_space<vmem>>, vector<1x1x1024xf32>,
    return
  }
  func.func @transform_0(%arg0: i32, %arg1: i32) -> (i32, i32, i32) {
    %c0_i32 = arith.constant 0 : i32
    %c0_i32_0 = arith.constant 0 : i32
    return %arg0, %c0_i32, %arg1 : i32, i32, i32
  }
  func.func @transform_1(%arg0: i32, %arg1: i32) -> (i32, i32, i32) {
    %c0_i32 = arith.constant 0 : i32
    %c0_i32_0 = arith.constant 0 : i32
    return %arg0, %arg1, %c0_i32 : i32, i32, i32
  }
}

module attributes {stable_mosaic.version = 11 : i64} {
  func.func @_nhwc_safe_kernel(%arg0: i32, %arg1: i32, %arg2: memref<1x4x16x16xf32, #tpu.memory_space<vmem>>, %arg3: memref<1x16x16x4xf32, #tpu.memory_space<vmem>>) attributes {dimension_semantics = [#tpu.dimension_semantics<parallel>, #tpu.dimension_semantics<parallel>], iteration_bounds = array<i64: 2, 1>, scalar_prefetch = 0 : i64, scratch_operands = 0 : i64, tpu.core_type = #tpu.core_type<tc>, window_params = [{transform_indices = @transform_0, window_bounds = array<i64: 1, 4, 16, 16>}, {transform_indices = @transform_1, window_bounds = array<i64: 1, 16, 16, 4>}]} {
    %c0 = arith.constant 0 : index
    %c0_0 = arith.constant 0 : index
    %c0_1 = arith.constant 0 : index
    %c0_2 = arith.constant 0 : index
    %0 = vector.load %arg2[%c0, %c0_0, %c0_1, %c0_2] : memref<1x4x16x16xf32, #tpu.memory_space<vmem>>, vector<1x4x16x16xf32>
    %1 = vector.shape_cast %0 : vector<1x4x16x16xf32> to vector<4x16x16xf32>
    %2 = tpu.transpose %1, [1, 2, 0] : vector<4x16x16xf32> -> vector<16x16x4xf32>
    %c0_3 = arith.constant 0 : index
    %c0_4 = arith.constant 0 : index
    %c0_5 = arith.constant 0 : index
    %c0_6 = arith.constant 0 : index
    %3 = vector.load %arg3[%c0_3, %c0_4, %c0_5, %c0_6] : memref<1x16x16x4xf32, #tpu.memory_space<vmem>>, vector<1x16x16x4xf32>
    %4 = vector.shape_cast %3 : vector<1x16x16x4xf32> to vector<16x16x4xf32>
    %5 = vector.shape_cast %2 : vector<16x16x4xf32> to vector<1x16x16x4xf32>
    tpu.vector_store %arg3[%c0_3, %c0_4, %c0_5, %c0_6], %5 {strides = array<i32>} : memref<1x16x16x4xf32, #tpu.memory_space<vmem>>, vector<1x16x16x4xf32>,
    return
  }
  func.func @transform_0(%arg0: i32, %arg1: i32) -> (i32, i32, i32, i32) {
    %c0_i32 = arith.constant 0 : i32
    %c0_i32_0 = arith.constant 0 : i32
    %c0_i32_1 = arith.constant 0 : i32
    return %arg0, %c0_i32, %arg1, %c0_i32_0 : i32, i32, i32, i32
  }
  func.func @transform_1(%arg0: i32, %arg1: i32) -> (i32, i32, i32, i32) {
    %c0_i32 = arith.constant 0 : i32
    %c0_i32_0 = arith.constant 0 : i32
    %c0_i32_1 = arith.constant 0 : i32
    return %arg0, %arg1, %c0_i32, %c0_i32_0 : i32, i32, i32, i32
  }
}

</mosaic_0001>

<bundles_post_ra>
// kernel: tpu_custom_call.1
= control target key start
LH: loop header
LB: loop body
LE: loop exit
PB: predicated region body
PF: predicated region fallthrough
CT: control target
= control target key end

     0   :  { %6 = vsyncpa [#allocation3], 0  ;;  %s2093_s0 = inlined_call_operand.hbm [shape: f32[2,4,16,16], index: 0, kind: input, shape index: {}]   ;;  %s2094_s1 = inlined_call_operand.vmem [shape: f32[2,16,16,4], index: 1, kind: output, shape index: {}]  }
   0x1   :  { %8 = vsyncpa [#allocation3 + $0x1], 0  ;;  %s1802_s6 = smov 0   ;;  %s1804_s7 = smov 0  }
   0x2   :  { %s1806_s8 = smov 0   ;;  %s1808_s9 = smov 0  }
   0x3   :  { %s1810_s10 = smov 0   ;;  %s1812_s11 = smov 0  }
   0x4 LB: > { %s1629_s12 = sadd.s32 4294967295, %s1784_s11   ;;  %s26_s13 = sadd.s32 1, %s1780_s10  ;;  %s1784_s11 = sphi %s1812_s11, %s14_s11   ;;  %s1780_s10 = sphi %s1810_s10, %s2102_s10   ;;  %s1776_s9 = sphi %s1808_s9, %s2101_s9   ;;  %s1772_s8 = sphi %s1806_s8, %s2100_s8   ;;  %s1768_s7 = sphi %s1804_s7, %s2099_s7   ;;  %s1764_s6 = sphi %s1802_s6, %s2098_s6  }
   0x5   : > { %p28_p0 = scmp.ge.s32.totalorder %s26_s13, 2  ;;  %s35_s14 = sadd.s32 1, %s1772_s8 }
   0x6   : > { %p42_p1 = scmp.ne.s32.totalorder %s1772_s8, %s1768_s7  ;;  %p43_p2 = scmp.eq.s32.totalorder %s1784_s11, 0 }
   0x7   : > { %s2104_s13 = smov (%p28_p0, %s26_s13), 0  ;;  %p48_p4 = scmp.ne.s32.totalorder %s1768_s7, %s1764_s6 }
   0x8   : > { %p1838_p3 = por %p43_p2, %p42_p1  ;;  %s30_s16 = ssub.s32 %s1780_s10, %s2104_s13 }
   0x9   : > { %p49_p5 = scmp.eq.s32.totalorder %s1629_s12, 0  ;;  %p33_p6 = scmp.eq.s32.totalorder %s30_s16, 0 }
   0xa   : > { %p1650_p8 = scmp.lt.s32.totalorder %s1784_s11, 2  ;;  %s100_s19 = sand.u32 1, %s1772_s8  }
   0xb   : > { %p1845_p7 = por %p49_p5, %p48_p4  ;;  %s1642_s20 = sshll.u32 %s1780_s10, 10 }
   0xc   : > { %s1851_s18 = scalar_select %p33_p6, %s1772_s8, %s35_s14  }
   0xd   : > { %s1633_s21 = sshll.u32 %s100_s19, 6  ;;  %s1858_s24 = scalar_lea.hbm %s2093_s0, %s1642_s20 }
   0xe   : > { %s104_s25 = scalar_lea.vmem [#allocation2], %s1633_s21  ;;  %p1862_p9 = pnand %p1650_p8, %p1838_p3 }
   0xf   : > { %s113_s26 = sshll.u32 %s104_s25, 4  ;;  %s1868_s28 = scalar_lea.sflag [#allocation3], %s100_s19  ;;  %s1866_s26 = int_to_ptr.vmem [resolvable:$true] %s113_s26 }
  0x10   : > { %s1704_s29 = scalar_lea.hbm %s1858_s24, 1024  ;;  %p1706_p11 = pneg %p1862_p9 }
  0x11   : > { %p1705_p10 = scmp.ne.s32.totalorder %s1858_s24, %s1704_s29  ;;  %s1709_s3 = scalar_lea.hbm %s2093_s0, 2048 }
  0x12   : > { %p1710_p0 = scmp.lt.u32.totalorder %s1858_s24, %s2093_s0  ;;  %p1711_p1 = scmp.lt.u32.totalorder %s1709_s3, %s1704_s29 }
  0x13   : > { %p1707_p12 = pnand %p1706_p11, %p1705_p10  ;;  %p1713_p3 = scmp.lt.u32.totalorder %s1704_s29, %s1858_s24 }
  0x14   : > { %p1712_p2 = por %p1711_p1, %p1710_p0 }
  0x15   : > { %p1708_p13 = pneg %p1707_p12 }
  0x16   : > { %p1714_p4 = por %p1713_p3, %p1712_p2 }
  0x18   : > { %p1715_p5 = pnand %p1714_p4, %p1708_p13 }
  0x1a   : > { %1718 = shalt.err (!%p1715_p5)
}
  0x1b   : > { %s1719_s6 = scalar_lea.vmem %s1866_s26, 1024  ;;  %s1786_s12 = smov [#allocation2]  }
  0x1c   : > { %p1720_p6 = scmp.ne.s32.totalorder %s1866_s26, %s1719_s6  ;;  %s1724_s14 = sshll.u32 %s1786_s12, 4  ;;  %s1725_s14 = int_to_ptr.vmem [resolvable:$false] %s1724_s14 }
  0x1d   : > { %s1726_s15 = scalar_lea.vmem %s1725_s14, 2048  ;;  %p1727_p12 = scmp.lt.s32.totalorder %s1866_s26, %s1725_s14 }
  0x1e   : > { %p1722_p8 = pnand %p1720_p6, %p1706_p11  ;;  %p1728_p0 = scmp.lt.s32.totalorder %s1726_s15, %s1719_s6 }
  0x20   : > { %p1723_p10 = pneg %p1722_p8  ;;  %p1729_p1 = por %p1728_p0, %p1727_p12 }
  0x22   : > { %p1730_p2 = pnand %p1729_p1, %p1723_p10 }
  0x24   : > { %1733 = shalt.err (!%p1730_p2)
}
  0x25   : > { %s1787_s16 = smov 128   ;;  %s1788_s19 = smov 8  }
  0x26   : > { %1649 = dma.hbm_to_vmem [thread:$0]  (!%p1862_p9), %s1858_s24, 1024, %s1866_s26, %s1868_s28, %s1787_s16, %s1787_s16, %s1788_s19  }
  0x27   : > { %p1636_p11 = scmp.ge.s32.totalorder %s1784_s11, 1  ;;  %p121_p13 = scmp.lt.s32.totalorder %s1784_s11, 3 }
  0x29   : > { %p122_p3 = pnand %p1636_p11, %p121_p13 }
  0x2a   : > { %s127_s20 = sand.u32 (!%p122_p3), 1, %s1768_s7  }
  0x2b   : > { %125 = sbr.rel (%p122_p3) target bundleno = 404 (0x194), region = 24  ;;  %s1637_s21 = sshll.u32 (!%p122_p3), %s127_s20, 6 }
  0x2c   : > { %s128_s22 = scalar_lea.sflag (!%p122_p3), [#allocation3], %s127_s20  ;;  %s131_s23 = scalar_lea.vmem (!%p122_p3), [#allocation2], %s1637_s21 }
  0x32   : > { %1759 = dma.done.wait (%p1845_p7), %s128_s22, 1024  }
  0x33   : > { %1761 = vsyncadd (%p1845_p7), %s128_s22, 4294966272  ;;  %v169_v0 = vld [vmem:[%s131_s23 + $0x10] sm:$0xff]  ;;  %v167_v1 = vld [vmem:[%s131_s23] sm:$0xff]  ;;  %v1789_v8 = vmov 1983009808   ;;  %v308_v10 = vlaneseq  ;;  %v1791_v35 = vmov 0.0  }
  0x34   : > { %207 = vxpose.xlu1.b32.start [1/2] (short) (narrow) %v169_v0, 16  ;;  %175 = vxpose.xlu0.b32.start [1/2] (short) (narrow) %v167_v1, 16  ;;  %v170_v2 = vld [vmem:[%s131_s23 + $0x18] sm:$0xff]  ;;  %v168_v3 = vld [vmem:[%s131_s23 + $0x8] sm:$0xff]  ;;  %v173_v4 = vld [vmem:[%s131_s23 + $0x30] sm:$0xff]  ;;  %v306_v9 = vunpack.c.l.s4 %v1789_v8  ;;  %p157_p7 = scmp.lt.s32.totalorder %s1776_s9, 1 }
  0x35   : > { %v171_v5 = vld [vmem:[%s131_s23 + $0x20] sm:$0xff]  ;;  %v174_v6 = vld [vmem:[%s131_s23 + $0x38] sm:$0xff]  ;;  %v172_v7 = vld [vmem:[%s131_s23 + $0x28] sm:$0xff]  ;;  %v309_v14 = vshrl.u32 %v308_v10, 7  ;;  %v1790_v17 = vmov 1934713408  }
  0x36   : > { %v307_v13 = vunpack.c.0.s8 %v306_v9  ;;  %v338_v18 = vunpack.c.l.s4 %v1790_v17  ;;  %vm1495_vm0 = vcmask 31744   ;;  %s2106_s9 = smov (!%p157_p7, %s1776_s9), 1 }
  0x37   : > { %s1643_s17 = sshll.u32 %s2106_s9, 8 }
  0x38   : > { %208 = vxpose.xlu1.b32.end [2/2] (short) (narrow) %v170_v2, 16  ;;  %176 = vxpose.xlu0.b32.end [2/2] (short) (narrow) %v168_v3, 16  ;;  %v1903_v19 = vsub.s32 %v307_v13, %v309_v14  ;;  %v339_v22 = vunpack.c.0.s8 %v338_v18  ;;  %s1959_s25 = scalar_lea.vmem %s2094_s1, %s1643_s17 }
  0x3a   : > { %v1907_v29 = vsub.s32 %v339_v22, %v309_v14 }
  0x3c   : > { %271 = vxpose.xlu1.b32.start [1/2] (short) (narrow) %v173_v4, 16  ;;  %239 = vxpose.xlu0.b32.start [1/2] (short) (narrow) %v171_v5, 16 }
  0x40   : > { %272 = vxpose.xlu1.b32.end [2/2] (short) (narrow) %v174_v6, 16  ;;  %240 = vxpose.xlu0.b32.end [2/2] (short) (narrow) %v172_v7, 16 }
  0xb4   : > { %v223_v11 = vpop.trf.xlu1  ;;  %v191_v12 = vpop.trf.xlu0 }
  0xb8   : > { %v224_v15 = vpop.trf.xlu1  ;;  %v192_v16 = vpop.trf.xlu0 }
  0xbc   : > { %v287_v20 = vpop.trf.xlu1  ;;  %v255_v21 = vpop.trf.xlu0 }
  0xbd   : > { %v319_v23 = vcombine.low %v223_v11, %v287_v20  ;;  %v303_v24 = vcombine.low %v191_v12, %v255_v21  ;;  %v320_v27 = vcombine.high %v223_v11, %v287_v20  ;;  %v304_v28 = vcombine.high %v191_v12, %v255_v21 }
  0xbf   : > { %v327_v25 = vrot.slane %v319_v23, %v1903_v19  ;;  %v311_v26 = vrot.slane %v303_v24, %v1903_v19  ;;  %v334_v32 = vrot.slane %v320_v27, %v1903_v19  ;;  %v318_v33 = vrot.slane %v304_v28, %v1903_v19 }
  0xc0   : > { %v288_v37 = vpop.trf.xlu1  ;;  %v256_v38 = vpop.trf.xlu0 }
  0xc1   : > { %v335_v30 = vcombine.low %v311_v26, %v327_v25  ;;  %v336_v31 = vcombine.high %v311_v26, %v327_v25  ;;  %v351_v40 = vcombine.low %v318_v33, %v334_v32  ;;  %v387_v41 = vcombine.low %v224_v15, %v288_v37 }
  0xc2   : > { %v371_v42 = vcombine.low %v192_v16, %v256_v38  ;;  %v352_v45 = vcombine.high %v318_v33, %v334_v32  ;;  %v388_v51 = vcombine.high %v224_v15, %v288_v37  ;;  %v372_v52 = vcombine.high %v192_v16, %v256_v38 }
  0xc3   : > { %v343_v34 = vrot.slane %v335_v30, %v1907_v29  ;;  %v350_v39 = vrot.slane %v336_v31, %v1907_v29  ;;  %v359_v44 = vrot.slane %v351_v40, %v1907_v29  ;;  %v395_v46 = vrot.slane %v387_v41, %v1903_v19 }
  0xc4   : > { %v379_v47 = vrot.slane %v371_v42, %v1903_v19  ;;  %v366_v49 = vrot.slane %v352_v45, %v1907_v29  ;;  %v402_v56 = vrot.slane %v388_v51, %v1903_v19  ;;  %v386_v57 = vrot.slane %v372_v52, %v1903_v19 }
  0xc5   : > { %439 = vxpose.xlu0.b32.start.end [1/1] (short) (narrow) %v343_v34, 16  ;;  %v367_v36 = vcombine.high %v343_v34, %v1791_v35  ;;  %v368_v43 = vcombine.high %v350_v39, %v1791_v35  ;;  %v369_v48 = vcombine.high %v359_v44, %v1791_v35 }
  0xc6   : > { %v403_v50 = vcombine.low %v379_v47, %v395_v46  ;;  %v370_v53 = vcombine.high %v366_v49, %v1791_v35  ;;  %v404_v55 = vcombine.high %v379_v47, %v395_v46  ;;  %v419_v60 = vcombine.low %v386_v57, %v402_v56 }
  0xc7   : > { %471 = vxpose.xlu1.b32.start.end [1/1] (short) (narrow) %v367_v36, 16  ;;  %v420_v63 = vcombine.high %v386_v57, %v402_v56 }
  0xc8   : > { %v411_v54 = vrot.slane %v403_v50, %v1907_v29  ;;  %v418_v59 = vrot.slane %v404_v55, %v1907_v29  ;;  %v427_v62 = vrot.slane %v419_v60, %v1907_v29 }
  0xc9   : > { %v434_v1 = vrot.slane %v420_v63, %v1907_v29 }
  0xca   : > { %503 = vxpose.xlu0.b32.start.end [1/1] (short) (narrow) %v350_v39, 16  ;;  %v435_v58 = vcombine.high %v411_v54, %v1791_v35  ;;  %v436_v61 = vcombine.high %v418_v59, %v1791_v35  ;;  %v437_v0 = vcombine.high %v427_v62, %v1791_v35 }
  0xcb   : > { %v438_v2 = vcombine.high %v434_v1, %v1791_v35 }
  0xcc   : > { %535 = vxpose.xlu1.b32.start.end [1/1] (short) (narrow) %v368_v43, 16 }
  0xcf   : > { %567 = vxpose.xlu0.b32.start.end [1/1] (short) (narrow) %v359_v44, 16 }
  0xd1   : > { %599 = vxpose.xlu1.b32.start.end [1/1] (short) (narrow) %v369_v48, 16 }
  0xd4   : > { %631 = vxpose.xlu0.b32.start.end [1/1] (short) (narrow) %v366_v49, 16 }
  0xd6   : > { %663 = vxpose.xlu1.b32.start.end [1/1] (short) (narrow) %v370_v53, 16 }
  0xd9   : > { %695 = vxpose.xlu0.b32.start.end [1/1] (short) (narrow) %v411_v54, 16 }
  0xdb   : > { %727 = vxpose.xlu1.b32.start.end [1/1] (short) (narrow) %v435_v58, 16 }
  0xde   : > { %759 = vxpose.xlu0.b32.start.end [1/1] (short) (narrow) %v418_v59, 16 }
  0xe0   : > { %791 = vxpose.xlu1.b32.start.end [1/1] (short) (narrow) %v436_v61, 16 }
  0xe3   : > { %823 = vxpose.xlu0.b32.start.end [1/1] (short) (narrow) %v427_v62, 16 }
  0xe5   : > { %855 = vxpose.xlu1.b32.start.end [1/1] (short) (narrow) %v437_v0, 16 }
  0xe8   : > { %887 = vxpose.xlu0.b32.start.end [1/1] (short) (narrow) %v434_v1, 16 }
  0xea   : > { %919 = vxpose.xlu1.b32.start.end [1/1] (short) (narrow) %v438_v2, 16 }
 0x145   : > { %v455_v3 = vpop.trf.xlu0 }
 0x147   : > { %v487_v4 = vpop.trf.xlu1 }
 0x149   : > { %v456_v5 = vpop.trf.xlu0 }
 0x14b   : > { %v488_v6 = vpop.trf.xlu1 }
 0x14d   : > { %v519_v7 = vpop.trf.xlu0 }
 0x14e   : > { %v951_v14 = vcombine.low %v455_v3, %v519_v7  ;;  %v952_v15 = vcombine.high %v455_v3, %v519_v7 }
 0x14f   : > { %v551_v8 = vpop.trf.xlu1 }
 0x150   : > { %v967_v11 = vcombine.low %v487_v4, %v551_v8  ;;  %v968_v12 = vcombine.high %v487_v4, %v551_v8  ;;  %v959_v21 = vrot.slane %v951_v14, %v1903_v19  ;;  %v966_v22 = vrot.slane %v952_v15, %v1903_v19 }
 0x151   : > { %v520_v9 = vpop.trf.xlu0 }
 0x152   : > { %v975_v17 = vrot.slane %v967_v11, %v1903_v19  ;;  %v982_v18 = vrot.slane %v968_v12, %v1903_v19  ;;  %v1223_v23 = vcombine.low %v456_v5, %v520_v9  ;;  %v1224_v27 = vcombine.high %v456_v5, %v520_v9 }
 0x153   : > { %v552_v10 = vpop.trf.xlu1 }
 0x154   : > { %v1239_v24 = vcombine.low %v488_v6, %v552_v10  ;;  %v1015_v26 = vcombine.low %v959_v21, %v975_v17  ;;  %v1016_v28 = vcombine.high %v959_v21, %v975_v17  ;;  %v1031_v30 = vcombine.low %v966_v22, %v982_v18 }
 0x155   : > { %v583_v13 = vpop.trf.xlu0  ;;  %v1032_v31 = vcombine.high %v966_v22, %v982_v18  ;;  %v1240_v32 = vcombine.high %v488_v6, %v552_v10  ;;  %v1231_v36 = vrot.slane %v1223_v23, %v1903_v19  ;;  %v1932_v40 = vrot.slane %v1224_v27, %v1903_v19 }
 0x156   : > { %v1247_v37 = vrot.slane %v1239_v24, %v1903_v19  ;;  %v1023_v39 = vrot.slane %v1015_v26, %v1907_v29  ;;  %v1030_v43 = vrot.slane %v1016_v28, %v1907_v29  ;;  %v1039_v44 = vrot.slane %v1031_v30, %v1907_v29 }
 0x157   : > { %v615_v16 = vpop.trf.xlu1  ;;  %v1046_v45 = vrot.slane %v1032_v31, %v1907_v29  ;;  %v1254_v46 = vrot.slane %v1240_v32, %v1903_v19 }
 0x158   : > { %v1287_v52 = vcombine.low %v1231_v36, %v1247_v37  ;;  %v1288_v53 = vcombine.high %v1231_v36, %v1247_v37 }
 0x159   : > { %v584_v20 = vpop.trf.xlu0  ;;  %v1303_v61 = vcombine.low %v1932_v40, %v1254_v46  ;;  %v1304_v62 = vcombine.high %v1932_v40, %v1254_v46 }
 0x15a   : > { %v1302_v26 = vrot.slane %v1288_v53, %v1907_v29 }
 0x15b   : > { %v616_v25 = vpop.trf.xlu1 }
 0x15d   : > { %v647_v33 = vpop.trf.xlu0 }
 0x15e   : > { %v983_v34 = vcombine.low %v583_v13, %v647_v33  ;;  %v984_v35 = vcombine.high %v583_v13, %v647_v33  ;;  %v1311_v33 = vrot.slane %v1303_v61, %v1907_v29 }
 0x15f   : > { %v679_v38 = vpop.trf.xlu1 }
 0x160   : > { %v999_v41 = vcombine.low %v615_v16, %v679_v38  ;;  %v1000_v42 = vcombine.high %v615_v16, %v679_v38  ;;  %v991_v48 = vrot.slane %v983_v34, %v1903_v19  ;;  %v998_v49 = vrot.slane %v984_v35, %v1903_v19 }
 0x161   : > { %v648_v47 = vpop.trf.xlu0  ;;  %v1318_v34 = vrot.slane %v1304_v62, %v1907_v29 }
 0x162   : > { %v1007_v50 = vrot.slane %v999_v41, %v1903_v19  ;;  %v1014_v51 = vrot.slane %v1000_v42, %v1903_v19  ;;  %v1255_v54 = vcombine.low %v584_v20, %v648_v47  ;;  %v1256_v55 = vcombine.high %v584_v20, %v648_v47 }
 0x163   : > { %v680_v56 = vpop.trf.xlu1 }
 0x164   : > { %v1047_v57 = vcombine.low %v991_v48, %v1007_v50  ;;  %v1048_v58 = vcombine.high %v991_v48, %v1007_v50  ;;  %v1063_v59 = vcombine.low %v998_v49, %v1014_v51  ;;  %v1064_v60 = vcombine.high %v998_v49, %v1014_v51 }
 0x165   : > { %v1271_v63 = vcombine.low %v616_v25, %v680_v56  ;;  %v1272_v0 = vcombine.high %v616_v25, %v680_v56  ;;  %v1950_v1 = vpop.trf.xlu0  ;;  %v1263_v6 = vrot.slane %v1255_v54, %v1903_v19  ;;  %v1270_v7 = vrot.slane %v1256_v55, %v1903_v19 }
 0x166   : > { %v1055_v2 = vrot.slane %v1047_v57, %v1907_v29  ;;  %v1062_v3 = vrot.slane %v1048_v58, %v1907_v29  ;;  %v1071_v4 = vrot.slane %v1063_v59, %v1907_v29  ;;  %v1078_v5 = vrot.slane %v1064_v60, %v1907_v29 }
 0x167   : > { %v1279_v8 = vrot.slane %v1271_v63, %v1903_v19  ;;  %v1286_v9 = vrot.slane %v1272_v0, %v1903_v19  ;;  %v743_v10 = vpop.trf.xlu1  ;;  %v1295_v25 = vrot.slane %v1287_v52, %v1907_v29 }
 0x168   : > { %v1079_v11 = vcombine.low %v1023_v39, %v1055_v2  ;;  %v1080_v12 = vcombine.high %v1023_v39, %v1055_v2  ;;  %v1081_v13 = vcombine.low %v1030_v43, %v1062_v3  ;;  %v1082_v14 = vcombine.high %v1030_v43, %v1062_v3 }
 0x169   : > { %v1083_v15 = vcombine.low %v1039_v44, %v1071_v4  ;;  %v1084_v16 = vcombine.high %v1039_v44, %v1071_v4  ;;  %v1085_v17 = vcombine.low %v1046_v45, %v1078_v5  ;;  %v1086_v18 = vcombine.high %v1046_v45, %v1078_v5  ;;  %v1965_v20 = vpop.trf.xlu0 }
 0x16a   : > { %1496 = vst.msk [vmem:[%s1959_s25] sm:$0xff] %vm1495_vm0, %v1079_v11  ;;  %1498 = vst.msk [vmem:[%s1959_s25 + $0x10] sm:$0xff] %vm1495_vm0, %v1080_v12  ;;  %v1319_v21 = vcombine.low %v1263_v6, %v1279_v8  ;;  %v1320_v22 = vcombine.high %v1263_v6, %v1279_v8  ;;  %v1335_v23 = vcombine.low %v1270_v7, %v1286_v9 }
 0x16b   : > { %1500 = vst.msk [vmem:[%s1959_s25 + $0x20] sm:$0xff] %vm1495_vm0, %v1081_v13  ;;  %1502 = vst.msk [vmem:[%s1959_s25 + $0x30] sm:$0xff] %vm1495_vm0, %v1082_v14  ;;  %v1336_v24 = vcombine.high %v1270_v7, %v1286_v9  ;;  %v744_v27 = vpop.trf.xlu1 }
 0x16c   : > { %1504 = vst.msk [vmem:[%s1959_s25 + $0x40] sm:$0xff] %vm1495_vm0, %v1083_v15  ;;  %1506 = vst.msk [vmem:[%s1959_s25 + $0x50] sm:$0xff] %vm1495_vm0, %v1084_v16  ;;  %v1327_v28 = vrot.slane %v1319_v21, %v1907_v29  ;;  %v1334_v30 = vrot.slane %v1320_v22, %v1907_v29  ;;  %v1343_v31 = vrot.slane %v1335_v23, %v1907_v29 }
 0x16d   : > { %1508 = vst.msk [vmem:[%s1959_s25 + $0x60] sm:$0xff] %vm1495_vm0, %v1085_v17  ;;  %1510 = vst.msk [vmem:[%s1959_s25 + $0x70] sm:$0xff] %vm1495_vm0, %v1086_v18  ;;  %v1350_v32 = vrot.slane %v1336_v24, %v1907_v29  ;;  %v775_v35 = vpop.trf.xlu0 }
 0x16e   : > { %v1351_v36 = vcombine.low %v1295_v25, %v1327_v28  ;;  %v1352_v37 = vcombine.high %v1295_v25, %v1327_v28  ;;  %v1353_v38 = vcombine.low %v1302_v26, %v1334_v30  ;;  %v1354_v39 = vcombine.high %v1302_v26, %v1334_v30 }
 0x16f   : > { %v1355_v40 = vcombine.low %v1311_v33, %v1343_v31  ;;  %v1356_v41 = vcombine.high %v1311_v33, %v1343_v31  ;;  %v1357_v42 = vcombine.low %v1318_v34, %v1350_v32  ;;  %v1358_v43 = vcombine.high %v1318_v34, %v1350_v32  ;;  %v807_v44 = vpop.trf.xlu1 }
 0x170   : > { %1512 = vst.msk [vmem:[%s1959_s25 + $0x80] sm:$0xff] %vm1495_vm0, %v1351_v36  ;;  %1514 = vst.msk [vmem:[%s1959_s25 + $0x90] sm:$0xff] %vm1495_vm0, %v1352_v37  ;;  %v1103_v47 = vcombine.low %v743_v10, %v807_v44  ;;  %v1104_v48 = vcombine.high %v743_v10, %v807_v44  ;;  %v1087_v50 = vcombine.low %v1950_v1, %v775_v35 }
 0x171   : > { %1516 = vst.msk [vmem:[%s1959_s25 + $0xa0] sm:$0xff] %vm1495_vm0, %v1353_v38  ;;  %1518 = vst.msk [vmem:[%s1959_s25 + $0xb0] sm:$0xff] %vm1495_vm0, %v1354_v39  ;;  %v776_v45 = vpop.trf.xlu0  ;;  %v1088_v51 = vcombine.high %v1950_v1, %v775_v35 }
 0x172   : > { %1520 = vst.msk [vmem:[%s1959_s25 + $0xc0] sm:$0xff] %vm1495_vm0, %v1355_v40  ;;  %1522 = vst.msk [vmem:[%s1959_s25 + $0xd0] sm:$0xff] %vm1495_vm0, %v1356_v41  ;;  %v1111_v53 = vrot.slane %v1103_v47, %v1903_v19  ;;  %v1118_v54 = vrot.slane %v1104_v48, %v1903_v19  ;;  %v1095_v56 = vrot.slane %v1087_v50, %v1903_v19 }
 0x173   : > { %1524 = vst.msk [vmem:[%s1959_s25 + $0xe0] sm:$0xff] %vm1495_vm0, %v1357_v42  ;;  %1526 = vst.msk [vmem:[%s1959_s25 + $0xf0] sm:$0xff] %vm1495_vm0, %v1358_v43  ;;  %v808_v46 = vpop.trf.xlu1  ;;  %v1102_v57 = vrot.slane %v1088_v51, %v1903_v19  ;;  %v1359_v58 = vcombine.low %v1965_v20, %v776_v45  ;;  %v1360_v62 = vcombine.high %v1965_v20, %v776_v45 }
 0x174   : > { %v1375_v59 = vcombine.low %v744_v27, %v808_v46  ;;  %v1151_v61 = vcombine.low %v1095_v56, %v1111_v53  ;;  %v1152_v63 = vcombine.high %v1095_v56, %v1111_v53  ;;  %v1376_v2 = vcombine.high %v744_v27, %v808_v46 }
 0x175   : > { %v839_v49 = vpop.trf.xlu0  ;;  %v1167_v0 = vcombine.low %v1102_v57, %v1118_v54  ;;  %v1168_v1 = vcombine.high %v1102_v57, %v1118_v54  ;;  %v1367_v6 = vrot.slane %v1359_v58, %v1903_v19  ;;  %v1374_v10 = vrot.slane %v1360_v62, %v1903_v19 }
 0x176   : > { %v1383_v7 = vrot.slane %v1375_v59, %v1903_v19  ;;  %v1159_v9 = vrot.slane %v1151_v61, %v1907_v29  ;;  %v1166_v13 = vrot.slane %v1152_v63, %v1907_v29  ;;  %v1390_v16 = vrot.slane %v1376_v2, %v1903_v19 }
 0x177   : > { %v871_v52 = vpop.trf.xlu1  ;;  %v1175_v14 = vrot.slane %v1167_v0, %v1907_v29  ;;  %v1182_v15 = vrot.slane %v1168_v1, %v1907_v29 }
 0x178   : > { %v1423_v23 = vcombine.low %v1367_v6, %v1383_v7  ;;  %v1424_v24 = vcombine.high %v1367_v6, %v1383_v7  ;;  %v1439_v33 = vcombine.low %v1374_v10, %v1390_v16  ;;  %v1440_v34 = vcombine.high %v1374_v10, %v1390_v16 }
 0x179   : > { %v840_v55 = vpop.trf.xlu0 }
 0x17a   : > { %v1431_v56 = vrot.slane %v1423_v23, %v1907_v29  ;;  %v1438_v57 = vrot.slane %v1424_v24, %v1907_v29  ;;  %v1447_v62 = vrot.slane %v1439_v33, %v1907_v29  ;;  %v1454_v63 = vrot.slane %v1440_v34, %v1907_v29 }
 0x17b   : > { %v872_v60 = vpop.trf.xlu1 }
 0x17d   : > { %v903_v3 = vpop.trf.xlu0 }
 0x17e   : > { %v1119_v4 = vcombine.low %v839_v49, %v903_v3  ;;  %v1120_v5 = vcombine.high %v839_v49, %v903_v3 }
 0x17f   : > { %v935_v8 = vpop.trf.xlu1 }
 0x180   : > { %v1135_v11 = vcombine.low %v871_v52, %v935_v8  ;;  %v1136_v12 = vcombine.high %v871_v52, %v935_v8  ;;  %v1127_v18 = vrot.slane %v1119_v4, %v1903_v19  ;;  %v1134_v20 = vrot.slane %v1120_v5, %v1903_v19 }
 0x181   : > { %v904_v17 = vpop.trf.xlu0 }
 0x182   : > { %v1143_v21 = vrot.slane %v1135_v11, %v1903_v19  ;;  %v1150_v22 = vrot.slane %v1136_v12, %v1903_v19  ;;  %v1391_v25 = vcombine.low %v840_v55, %v904_v17  ;;  %v1392_v26 = vcombine.high %v840_v55, %v904_v17 }
 0x183   : > { %v936_v27 = vpop.trf.xlu1 }
 0x184   : > { %v1183_v28 = vcombine.low %v1127_v18, %v1143_v21  ;;  %v1184_v30 = vcombine.high %v1127_v18, %v1143_v21  ;;  %v1199_v31 = vcombine.low %v1134_v20, %v1150_v22  ;;  %v1200_v32 = vcombine.high %v1134_v20, %v1150_v22 }
 0x185   : > { %v1407_v35 = vcombine.low %v872_v60, %v936_v27  ;;  %v1408_v36 = vcombine.high %v872_v60, %v936_v27  ;;  %v1399_v41 = vrot.slane %v1391_v25, %v1903_v19  ;;  %v1406_v42 = vrot.slane %v1392_v26, %v1903_v19 }
 0x186   : > { %v1191_v37 = vrot.slane %v1183_v28, %v1907_v29  ;;  %v1198_v38 = vrot.slane %v1184_v30, %v1907_v29  ;;  %v1207_v39 = vrot.slane %v1199_v31, %v1907_v29  ;;  %v1214_v40 = vrot.slane %v1200_v32, %v1907_v29 }
 0x187   : > { %v1415_v43 = vrot.slane %v1407_v35, %v1903_v19  ;;  %v1422_v44 = vrot.slane %v1408_v36, %v1903_v19 }
 0x188   : > { %v1215_v45 = vcombine.low %v1159_v9, %v1191_v37  ;;  %v1216_v46 = vcombine.high %v1159_v9, %v1191_v37  ;;  %v1217_v47 = vcombine.low %v1166_v13, %v1198_v38  ;;  %v1218_v48 = vcombine.high %v1166_v13, %v1198_v38 }
 0x189   : > { %v1219_v49 = vcombine.low %v1175_v14, %v1207_v39  ;;  %v1220_v50 = vcombine.high %v1175_v14, %v1207_v39  ;;  %v1221_v51 = vcombine.low %v1182_v15, %v1214_v40  ;;  %v1222_v52 = vcombine.high %v1182_v15, %v1214_v40 }
 0x18a   : > { %1497 = vst.msk [vmem:[%s1959_s25 + $0x8] sm:$0xff] %vm1495_vm0, %v1215_v45  ;;  %1499 = vst.msk [vmem:[%s1959_s25 + $0x18] sm:$0xff] %vm1495_vm0, %v1216_v46  ;;  %v1455_v19 = vcombine.low %v1399_v41, %v1415_v43  ;;  %v1456_v53 = vcombine.high %v1399_v41, %v1415_v43  ;;  %v1471_v54 = vcombine.low %v1406_v42, %v1422_v44 }
 0x18b   : > { %1501 = vst.msk [vmem:[%s1959_s25 + $0x28] sm:$0xff] %vm1495_vm0, %v1217_v47  ;;  %1503 = vst.msk [vmem:[%s1959_s25 + $0x38] sm:$0xff] %vm1495_vm0, %v1218_v48  ;;  %v1472_v55 = vcombine.high %v1406_v42, %v1422_v44 }
 0x18c   : > { %1505 = vst.msk [vmem:[%s1959_s25 + $0x48] sm:$0xff] %vm1495_vm0, %v1219_v49  ;;  %1507 = vst.msk [vmem:[%s1959_s25 + $0x58] sm:$0xff] %vm1495_vm0, %v1220_v50  ;;  %v1463_v58 = vrot.slane %v1455_v19, %v1907_v29  ;;  %v1470_v59 = vrot.slane %v1456_v53, %v1907_v29  ;;  %v1479_v60 = vrot.slane %v1471_v54, %v1907_v29 }
 0x18d   : > { %1509 = vst.msk [vmem:[%s1959_s25 + $0x68] sm:$0xff] %vm1495_vm0, %v1221_v51  ;;  %1511 = vst.msk [vmem:[%s1959_s25 + $0x78] sm:$0xff] %vm1495_vm0, %v1222_v52  ;;  %v1486_v61 = vrot.slane %v1472_v55, %v1907_v29 }
 0x18e   : > { %v1487_v0 = vcombine.low %v1431_v56, %v1463_v58  ;;  %v1488_v1 = vcombine.high %v1431_v56, %v1463_v58  ;;  %v1489_v2 = vcombine.low %v1438_v57, %v1470_v59  ;;  %v1490_v3 = vcombine.high %v1438_v57, %v1470_v59 }
 0x18f   : > { %v1491_v4 = vcombine.low %v1447_v62, %v1479_v60  ;;  %v1492_v5 = vcombine.high %v1447_v62, %v1479_v60  ;;  %v1493_v6 = vcombine.low %v1454_v63, %v1486_v61  ;;  %v1494_v7 = vcombine.high %v1454_v63, %v1486_v61 }
 0x190   : > { %1513 = vst.msk [vmem:[%s1959_s25 + $0x88] sm:$0xff] %vm1495_vm0, %v1487_v0  ;;  %1515 = vst.msk [vmem:[%s1959_s25 + $0x98] sm:$0xff] %vm1495_vm0, %v1488_v1 }
 0x191   : > { %1517 = vst.msk [vmem:[%s1959_s25 + $0xa8] sm:$0xff] %vm1495_vm0, %v1489_v2  ;;  %1519 = vst.msk [vmem:[%s1959_s25 + $0xb8] sm:$0xff] %vm1495_vm0, %v1490_v3 }
 0x192   : > { %1521 = vst.msk [vmem:[%s1959_s25 + $0xc8] sm:$0xff] %vm1495_vm0, %v1491_v4  ;;  %1523 = vst.msk [vmem:[%s1959_s25 + $0xd8] sm:$0xff] %vm1495_vm0, %v1492_v5 }
 0x193   : > { %1525 = vst.msk [vmem:[%s1959_s25 + $0xe8] sm:$0xff] %vm1495_vm0, %v1493_v6  ;;  %1527 = vst.msk [vmem:[%s1959_s25 + $0xf8] sm:$0xff] %vm1495_vm0, %v1494_v7 }
 0x194 PF: > { %s14_s11 = sadd.s32 1, %s1784_s11   ;;  %s2098_s6 = smov %s1768_s7 }
 0x195   : > { %p11_p9 = scmp.ge.s32.totalorder %s14_s11, 4   ;;  %s2099_s7 = smov %s1772_s8 }
 0x196   : > { %s2100_s8 = smov %s1851_s18  ;;  %s2101_s9 = smov %s1780_s10 }
 0x197   : > { %s2102_s10 = smov %s2104_s13  ;;  %13 = sbr.rel (!%p11_p9) target bundleno = 4 (0x4), region = 64 }
 0x19e   :  { %1560 = vsyncpa [#allocation3], 1 }
 0x19f   :  { %1562 = vsyncpa [#allocation3 + $0x1], 1 }

</bundles_post_ra>
